<compile_context>
chip_gen: v7x
topology: tpu7x:2x2x1
jax: 0.10.0
libtpu: 0.0.40
codegen_flags: <defaults>
</compile_context>

<pallas_src>
import math

import jax
import jax.numpy as jnp
from jax.experimental import pallas as pl
from jax.experimental.pallas import tpu as pltpu


def make_fixed_embedding_table(c_in, d_model, dtype=jnp.float32):
    """Builds the frozen sinusoidal table exactly like the PyTorch module."""
    position = jnp.arange(c_in, dtype=jnp.float32)[:, None]               # [c_in, 1]
    div_term = jnp.exp(
        jnp.arange(0, d_model, 2, dtype=jnp.float32)
        * -(math.log(10000.0) / d_model))                                  # [d_model/2]
    w = jnp.zeros((c_in, d_model), dtype=jnp.float32)
    w = w.at[:, 0::2].set(jnp.sin(position * div_term))
    w = w.at[:, 1::2].set(jnp.cos(position * div_term))
    return w.astype(dtype)


def _fixed_embed_kernel(idx_ref, w_ref, o_ref):
    # idx_ref: (TM, 1) int32   w_ref: (C, Dp) f32 (resident)   o_ref: (TM, Dp)
    idx = idx_ref[...]                                           # (TM, 1)
    tm = idx.shape[0]
    c_in = w_ref.shape[0]
    col = jax.lax.broadcasted_iota(jnp.int32, (tm, c_in), 1)      # (TM, C)
    onehot = (idx == col).astype(jnp.float32)                     # exact 0/1 selector
    out = jnp.dot(onehot, w_ref[...], preferred_element_type=jnp.float32)
    o_ref[...] = out.astype(o_ref.dtype)


def fixed_embedding(x_idx, table, *, tm=256):
    """x_idx: integer array of any shape, values in [0, c_in).
       table: [c_in, d_model] fixed sinusoidal table.
       Returns x_idx.shape + (d_model,), gradient-stopped (matches .detach())."""
    orig_shape = x_idx.shape
    c_in, d_model = table.shape

    # ---- flatten all index dims into one M axis (merged-M tiling) ----
    m = 1
    for s in orig_shape:
        m *= s
    idx_flat = x_idx.reshape(m).astype(jnp.int32)

    # ---- lane-dense output: pad d_model up to a multiple of 128 ----
    d_pad = pl.cdiv(d_model, 128) * 128
    table_p = table if d_pad == d_model else jnp.pad(
        table, ((0, 0), (0, d_pad - d_model)))

    # ---- M tiling: TM aligned to sublanes (8), capped for tiny inputs ----
    tm_eff = min(tm, pl.cdiv(m, 8) * 8)
    m_pad = pl.cdiv(m, tm_eff) * tm_eff
    if m_pad != m:
        idx_flat = jnp.pad(idx_flat, (0, m_pad - m))   # pad with index 0 (valid)
    idx2d = idx_flat.reshape(m_pad, 1)

    out = pl.pallas_call(
        _fixed_embed_kernel,
        out_shape=jax.ShapeDtypeStruct((m_pad, d_pad), table.dtype),
        grid_spec=pltpu.PrefetchScalarGridSpec(
            num_scalar_prefetch=0,
            grid=(m_pad // tm_eff,),
            in_specs=[
                pl.BlockSpec((tm_eff, 1), lambda i: (i, 0)),     # index tile
                pl.BlockSpec((c_in, d_pad), lambda i: (0, 0)),   # table, resident
            ],
            out_specs=pl.BlockSpec((tm_eff, d_pad), lambda i: (i, 0)),
        ),
        compiler_params=pltpu.CompilerParams(
            dimension_semantics=("parallel",)),
    )(idx2d, table_p)

    out = out[:m, :d_model]
    out = jax.lax.stop_gradient(out)   # matches .detach() / requires_grad=False
    return out.reshape(*orig_shape, d_model)


if __name__ == "__main__":
    key = jax.random.PRNGKey(0)

    # Small shapes consistent with FixedEmbedding usage (e.g. hour-of-day).
    B = 2          # batch
    L = 8          # sequence length
    C_IN = 24      # vocabulary size (c_in)
    D_MODEL = 32   # embedding dim (even, as required by the sin/cos fill)

    x = jax.random.randint(key, (B, L), 0, C_IN, dtype=jnp.int32)
    table = make_fixed_embedding_table(C_IN, D_MODEL)

    out = fixed_embedding(x, table)
    out = jax.block_until_ready(out)

    # Reference: plain-JAX gather from the same fixed table.
    ref = jnp.take(table, x, axis=0)
    assert out.shape == (B, L, D_MODEL), out.shape
    assert jnp.allclose(out, ref, atol=0.0, rtol=0.0), "mismatch vs. reference gather"

    print("KERNEL_OK")
</pallas_src>

<mosaic_0001>
module attributes {stable_mosaic.version = 11 : i64} {
  func.func @_fixed_embed_kernel(%arg0: i32, %arg1: memref<16x1xi32, #tpu.memory_space<vmem>>, %arg2: memref<24x128xf32, #tpu.memory_space<vmem>>, %arg3: memref<16x128xf32, #tpu.memory_space<vmem>>) attributes {dimension_semantics = [#tpu.dimension_semantics<parallel>], iteration_bounds = array<i64: 1>, scalar_prefetch = 0 : i64, scratch_operands = 0 : i64, tpu.core_type = #tpu.core_type<tc>, window_params = [{transform_indices = @transform_0, window_bounds = array<i64: 16, 1>}, {pipeline_mode = #tpu.pipeline_mode<synchronous>, transform_indices = @transform_1, window_bounds = array<i64: 24, 128>}, {transform_indices = @transform_2, window_bounds = array<i64: 16, 128>}]} {
    %c0 = arith.constant 0 : index
    %c0_0 = arith.constant 0 : index
    %0 = vector.load %arg1[%c0, %c0_0] : memref<16x1xi32, #tpu.memory_space<vmem>>, vector<16x1xi32>
    %1 = tpu.iota {dimensions = array<i32: 1>} : vector<16x24xi32>
    %2 = vector.broadcast %0 : vector<16x1xi32> to vector<16x24xi32>
    %3 = arith.cmpi eq, %2, %1 : vector<16x24xi32>
    %4 = arith.extui %3 : vector<16x24xi1> to vector<16x24xi32>
    %5 = arith.sitofp %4 : vector<16x24xi32> to vector<16x24xf32>
    %c0_1 = arith.constant 0 : index
    %c0_2 = arith.constant 0 : index
    %6 = vector.load %arg2[%c0_1, %c0_2] : memref<24x128xf32, #tpu.memory_space<vmem>>, vector<24x128xf32>
    %cst = arith.constant dense<0.000000e+00> : vector<16x128xf32>
    %7 = tpu.matmul %5, %6, %cst {dimension_numbers = #tpu.dot_dimension_numbers<[1], [0], [0], [1], [0, 0, 1, 1], [], []>} : vector<16x24xf32>, vector<24x128xf32>, vector<16x128xf32> -> vector<16x128xf32>
    %c0_3 = arith.constant 0 : index
    %c0_4 = arith.constant 0 : index
    %8 = vector.load %arg3[%c0_3, %c0_4] : memref<16x128xf32, #tpu.memory_space<vmem>>, vector<16x128xf32>
    tpu.vector_store %arg3[%c0_3, %c0_4], %7 {strides = array<i32>} : memref<16x128xf32, #tpu.memory_space<vmem>>, vector<16x128xf32>,
    return
  }
  func.func @transform_0(%arg0: i32) -> (i32, i32) {
    %c0_i32 = arith.constant 0 : i32
    %c0_i32_0 = arith.constant 0 : i32
    return %arg0, %c0_i32 : i32, i32
  }
  func.func @transform_1(%arg0: i32) -> (i32, i32) {
    %c0_i32 = arith.constant 0 : i32
    %c0_i32_0 = arith.constant 0 : i32
    %c0_i32_1 = arith.constant 0 : i32
    return %c0_i32, %c0_i32_0 : i32, i32
  }
  func.func @transform_2(%arg0: i32) -> (i32, i32) {
    %c0_i32 = arith.constant 0 : i32
    %c0_i32_0 = arith.constant 0 : i32
    return %arg0, %c0_i32 : i32, i32
  }
}

</mosaic_0001>

<bundles_post_ra>
// kernel: tpu_custom_call.1
= control target key start
LH: loop header
LB: loop body
LE: loop exit
PB: predicated region body
PF: predicated region fallthrough
CT: control target
= control target key end

     0   :  { %7 = vsyncpa [#allocation3], 0  ;;  %s280_s0 = inlined_call_operand.vmem [shape: s32[16,1], index: 0, kind: input, shape index: {}]   ;;  %s281_s1 = inlined_call_operand.hbm [shape: f32[24,128], index: 1, kind: input, shape index: {}]   ;;  %s282_s2 = inlined_call_operand.hbm [shape: f32[16,128], index: 2, kind: output, shape index: {}]  }
   0x1   :  { %8 = vsyncpa [#allocation4], 0  ;;  %s223_s9 = smov [#allocation2]   ;;  %s175_s13 = scalar_lea.hbm %s281_s1, 384 }
   0x2   :  { %s16_s10 = sshll.u32 %s223_s9, 4  ;;  %p176_p0 = scmp.ne.s32.totalorder %s281_s1, %s175_s13  ;;  %s17_s10 = int_to_ptr.vmem [resolvable:$true] %s16_s10 }
   0x3   :  { %p179_p1 = scmp.lt.u32.totalorder %s175_s13, %s281_s1 }
   0x5   :  { %p181_p2 = pnand %p179_p1, %p176_p0 }
   0x7   :  { %184 = shalt.err (!%p181_p2)
}
   0x8   :  { %s185_s18 = scalar_lea.vmem %s17_s10, 384  ;;  %p190_p4 = scmp.lt.s32.totalorder %s17_s10, %s17_s10 }
   0x9   :  { %p186_p3 = scmp.ne.s32.totalorder %s17_s10, %s185_s18  ;;  %p191_p5 = scmp.lt.s32.totalorder %s185_s18, %s185_s18 }
   0xb   :  { %p192_p6 = por %p191_p5, %p190_p4 }
   0xd   :  { %p193_p7 = pnand %p192_p6, %p186_p3 }
   0xf   :  { %196 = shalt.err (!%p193_p7)
}
  0x10   :  { %s224_s19 = smov 128   ;;  %s225_s20 = smov 8  }
  0x11   :  { %22 = dma.hbm_to_vmem [thread:$0]  %s281_s1, 384, %s17_s10, [#allocation3], %s224_s19, %s224_s19, %s225_s20  }
  0x12   :  { %219 = dma.done.wait [#allocation3], 384  }
  0x13   :  { %220 = vsyncadd [#allocation3], 4294966912  ;;  %v226_v0 = vmov 0   ;;  %v26_v1 = vld [vmem:[%s280_s0] sm:$0xff]  ;;  %v43_v3 = vld [vmem:[#allocation2 + $0x8] sm:$0xff]  ;;  %v28_v7 = vlaneseq  ;;  %vm45_vm0 = vcmask 195584  }
  0x14   :  { %174 = vset.pattern.permute.xlu0 %v226_v0  ;;  %v42_v2 = vld [vmem:[#allocation2] sm:$0xff]  ;;  %v27_v4 = vld [vmem:[%s280_s0 + $0x8] sm:$0xff]  ;;  %v44_v6 = vld [vmem:[#allocation2 + $0x10] sm:$0xff]  ;;  %v227_v10 = vmov 0.0   ;;  %s228_s0 = smov [#allocation5]  }
  0x15   :  { %31 = vperm.xlu0 %174, %v26_v1   ;;  %v164_v5 = vpack.c.bf16 %v43_v3, %v42_v2  ;;  %v29_v8 = vand.u32 127, %v28_v7  ;;  %s134_s1 = sshll.u32 %s228_s0, 4  ;;  %s135_s1 = int_to_ptr.vmem [resolvable:$true] %s134_s1 }
  0x16   :  { %s197_s27 = scalar_lea.vmem %s135_s1, 256  ;;  %p202_p9 = scmp.lt.s32.totalorder %s135_s1, %s135_s1 }
  0x17   :  { %165 = vmatprep.subr.bf16.mxu0 %v164_v5  ;;  %p198_p8 = scmp.ne.s32.totalorder %s135_s1, %s197_s27  ;;  %p203_p10 = scmp.lt.s32.totalorder %s197_s27, %s197_s27 }
  0x18   :  { %167 = vmatpush3.bf16.msra.mxu0 %v164_v5 }
  0x19   :  { %34 = vperm.xlu0 %174, %v27_v4   ;;  %159 = vmatprep.subr.mxu0 %v44_v6  ;;  %p204_p11 = por %p203_p10, %p202_p9 }
  0x1b   :  { %p205_p12 = pnand %p204_p11, %p198_p8 }
  0x1c   :  { %160 = vmatpush3.msra.mxu0 %v44_v6 }
  0x94   :  { %v32_v9 = vpop.permute.xlu0 %31 }
  0x95   :  { %vm36_vm1 = vcmp.eq.s32.totalorder %v32_v9, %v29_v8 }
  0x96   :  { %v146_v11 = vsel %vm36_vm1, 1.0, %v227_v10 }
  0x97   :  { %161 = vmatprep.mubr.msk.f32.mxu0 %vm45_vm0, %v146_v11 }
  0x98   :  { %v35_v12 = vpop.permute.xlu0 %34 }
  0x99   :  { %vm37_vm2 = vcmp.eq.s32.totalorder %v35_v12, %v29_v8 }
  0x9a   :  { %v147_v13 = vsel %vm37_vm2, 1.0, %v227_v10 }
  0x9b   :  { %162 = vmatmul.mubr.msk.f32.vlgmr.msra.gmra.mrb[0].mxu0 %vm45_vm0, %v147_v13 }
 0x16e   :  { %v163_v14 = vpop.f32.mrb[0].mxu0 }
 0x16f   :  { %128 = vst [vmem:[#allocation5 + $0x8] sm:$0xff] %v163_v14  ;;  %v118_v15 = vpop.f32.mrb[1].mxu0 }
 0x170   :  { %127 = vst [vmem:[#allocation5] sm:$0xff] %v118_v15 }
 0x171   :  { %208 = shalt.err (!%p205_p12)
}
 0x172   :  { %s209_s30 = scalar_lea.hbm %s282_s2, 256 }
 0x173   :  { %p210_p13 = scmp.ne.s32.totalorder %s282_s2, %s209_s30  ;;  %p213_p0 = scmp.lt.u32.totalorder %s209_s30, %s282_s2 }
 0x175   :  { %p215_p1 = pnand %p213_p0, %p210_p13 }
 0x177   :  { %218 = shalt.err (!%p215_p1)
}
 0x178   :  { %140 = dma.vmem_to_hbm [thread:$0]  %s135_s1, 256, %s282_s2, [#allocation4], %s224_s19, %s224_s19, %s225_s20  }
 0x179   :  { %221 = dma.done.wait [#allocation4], 256  }
 0x17a   :  { %222 = vsyncadd [#allocation4], 4294967040 }
 0x17b   :  { %144 = vsyncpa [#allocation3], 1 }
 0x17c   :  { %145 = vsyncpa [#allocation4], 1 }

</bundles_post_ra>
